<compile_context>
chip_gen: v7x
topology: tpu7x:2x2x1
jax: 0.10.0
libtpu: 0.0.40
codegen_flags: <defaults>
</compile_context>

<pallas_src>
import jax
import jax.numpy as jnp
import numpy as np
from jax import lax
from jax.experimental import pallas as pl
from jax.experimental.pallas import tpu as pltpu


# ----------------------------------------------------------------------------
# Kernel
# ----------------------------------------------------------------------------
def _make_fused_kernel(N, H, W, Cmid, Cout):
    Hp = H + 2                  # per-batch row-padded height
    M = N * Hp - 2              # matmul M (valid rows + 2 junk seam rows/batch)
    WCmid = W * Cmid            # lane width of one h row (=128 at test size)
    QC = 2 * W * Cout           # lane width of one full output row (=128)

    def kernel(x_ref, t1_ref, b1_ref, t2_ref, bt_ref, o_ref, hpad_ref):
        f32 = jnp.float32

        # -------- stage 1: 3x3 conv (padding folded into T1 / wrapper) --------
        # x_ref is the per-batch row-padded slab (N*(H+2), W*Cin); the three
        # kernel-row taps are just shifted sublane slices -- no concatenates.
        acc = jnp.dot(x_ref[0:M, :], t1_ref[0], preferred_element_type=f32)
        acc = acc + jnp.dot(x_ref[1:1 + M, :], t1_ref[1],
                            preferred_element_type=f32)
        acc = acc + jnp.dot(x_ref[2:2 + M, :], t1_ref[2],
                            preferred_element_type=f32)
        h = jnp.maximum(acc + b1_ref[...], 0.0)               # (M, W*Cmid) f32

        # Scatter h into its per-batch row-padded slot in VMEM scratch.  Seam /
        # boundary rows (2 per batch) are overwritten with zeros afterwards, so
        # every row of hpad is defined before stage 2 reads it.
        hpad_ref[1:1 + M, :] = h
        zrow = jnp.zeros((1, WCmid), hpad_ref.dtype)
        for n in range(N):                                    # 2N tiny stores
            hpad_ref[n * Hp:n * Hp + 1, :] = zrow
            hpad_ref[n * Hp + H + 1:n * Hp + H + 2, :] = zrow

        # ---- stage 2: ConvTranspose2d(k=4, s=2, p=1) + ReLU, polyphase rows ----
        cdt = t2_ref.dtype
        for a in range(2):                                    # output-row phase
            ya = jnp.dot(hpad_ref[a:a + M, :].astype(cdt), t2_ref[a, 0],
                         preferred_element_type=f32)
            ya = ya + jnp.dot(hpad_ref[a + 1:a + 1 + M, :].astype(cdt),
                              t2_ref[a, 1], preferred_element_type=f32)
            ya = jnp.maximum(ya + bt_ref[...], 0.0).astype(o_ref.dtype)
            # batch n, kernel-output row m, lanes [a*QC,(a+1)*QC) <-> y[n, 2m+a]
            for n in range(N):
                o_ref[n, :, a * QC:(a + 1) * QC] = ya[n * Hp:n * Hp + H, :]

    return kernel


# ----------------------------------------------------------------------------
# One-time parameter preparation (numpy, exact 0/1 placement, outside jit)
# ----------------------------------------------------------------------------
def prepare_params(params, W, compute_dtype=jnp.float32):
    """Expand conv weights into lane-dense row-Toeplitz matrices (once)."""
    w1 = np.asarray(params["w1"], np.float32)     # (Cmid, Cin, 3, 3)
    b1 = np.asarray(params["b1"], np.float32)
    wt = np.asarray(params["wt"], np.float32)     # (Cmid, Cout, 4, 4)
    bt = np.asarray(params["bt"], np.float32)
    Cmid, Cin = w1.shape[0], w1.shape[1]
    Cout = wt.shape[1]

    # T1[ky] : (W*Cin, W*Cmid),  h[m, n*Cmid+o] = sum_ky xrow_pad[m+ky] @ T1[ky]
    # Width padding folded in: taps with column index outside [0, W) dropped.
    T1 = np.zeros((3, W * Cin, W * Cmid), np.float32)
    for ky in range(3):
        for kx in range(3):
            blk = w1[:, :, ky, kx].T              # (Cin, Cmid)
            for n in range(W):
                j = n - 1 + kx
                if 0 <= j < W:
                    T1[ky, j * Cin:(j + 1) * Cin, n * Cmid:(n + 1) * Cmid] = blk

    # Polyphase transposed conv:  y[2m+a, 2n+b, o] =
    #   sum_{di,dj,c} hrow_pad[m+a+di, n-1+b+dj, c] * wt[c, o, kh[a,di], kw[b,dj]]
    # with kh = kw = [[3,1],[2,0]]; width padding folded into T2.
    kidx = ((3, 1), (2, 0))
    T2 = np.zeros((2, 2, W * Cmid, 2 * W * Cout), np.float32)
    for a in range(2):
        for di in range(2):
            kh = kidx[a][di]
            for b in range(2):
                for dj in range(2):
                    kw = kidx[b][dj]
                    blk = wt[:, :, kh, kw]        # (Cmid, Cout)
                    for n in range(W):
                        p = n - 1 + b + dj
                        if 0 <= p < W:
                            q = 2 * n + b
                            T2[a, di, p * Cmid:(p + 1) * Cmid,
                               q * Cout:(q + 1) * Cout] = blk

    return dict(
        T1=jnp.asarray(T1, compute_dtype),
        T2=jnp.asarray(T2, compute_dtype),
        b1t=jnp.asarray(np.tile(b1, W)[None, :], jnp.float32),
        btt=jnp.asarray(np.tile(bt, 2 * W)[None, :], jnp.float32),
    )


def init_params(key, in_ch, mid_ch, out_ch):
    k1, k2, k3, k4 = jax.random.split(key, 4)
    # nn.Conv2d(in_ch, mid_ch, 3, padding=1): weight (O, I, kH, kW), bias (O,)
    w1 = jax.random.normal(k1, (mid_ch, in_ch, 3, 3), jnp.float32) * 0.1
    b1 = jax.random.normal(k2, (mid_ch,), jnp.float32) * 0.1
    # nn.ConvTranspose2d(mid_ch, out_ch, 4, stride=2, padding=1):
    #   weight (in=mid, out, kH, kW), bias (out,)
    wt = jax.random.normal(k3, (mid_ch, out_ch, 4, 4), jnp.float32) * 0.1
    bt = jax.random.normal(k4, (out_ch,), jnp.float32) * 0.1
    return dict(w1=w1, b1=b1, wt=wt, bt=bt)


# ----------------------------------------------------------------------------
# Forward wrapper (jittable; prep arrays are pytree leaves, dims from shapes)
# ----------------------------------------------------------------------------
def decoder_block_v2_forward(x_nchw, prep):
    T1, T2, b1t, btt = prep["T1"], prep["T2"], prep["b1t"], prep["btt"]
    N, Cin, H, W = x_nchw.shape
    Cmid = T1.shape[2] // W
    Cout = T2.shape[3] // (2 * W)
    cdt = T1.dtype
    Hp = H + 2
    M = N * Hp - 2
    WCmid = W * Cmid
    QC = 2 * W * Cout

    # NCHW -> lane-dense NHWC rows, per-batch H zero-padding done here (one XLA
    # pass over the small input), then flattened into one (N*(H+2), W*Cin) slab.
    x_rows = jnp.transpose(x_nchw, (0, 2, 3, 1)).reshape(N, H, W * Cin)
    x_rows = jnp.pad(x_rows, ((0, 0), (1, 1), (0, 0)))
    x_slab = x_rows.reshape(N * Hp, W * Cin).astype(cdt)

    flops = 2 * 3 * M * (W * Cin) * WCmid + 2 * 4 * M * WCmid * QC
    bytes_accessed = (x_slab.size * x_slab.dtype.itemsize
                      + T1.size * T1.dtype.itemsize
                      + T2.size * T2.dtype.itemsize
                      + (b1t.size + btt.size) * 4
                      + N * H * 2 * QC * 4)

    out = pl.pallas_call(
        _make_fused_kernel(N, H, W, Cmid, Cout),
        out_shape=jax.ShapeDtypeStruct((N, H, 2 * QC), jnp.float32),
        grid=(1,),  # single step at toy size; H-tile + CORE_PARALLEL at scale
        in_specs=[
            pl.BlockSpec((N * Hp, W * Cin), lambda i: (0, 0)),
            pl.BlockSpec((3, W * Cin, WCmid), lambda i: (0, 0, 0)),
            pl.BlockSpec((1, WCmid), lambda i: (0, 0)),
            pl.BlockSpec((2, 2, WCmid, QC), lambda i: (0, 0, 0, 0)),
            pl.BlockSpec((1, QC), lambda i: (0, 0)),
        ],
        out_specs=pl.BlockSpec((N, H, 2 * QC), lambda i: (0, 0, 0)),
        scratch_shapes=[pltpu.VMEM((N * Hp, WCmid), jnp.float32)],
        compiler_params=pltpu.CompilerParams(
            dimension_semantics=("arbitrary",)),
        cost_estimate=pl.CostEstimate(flops=flops, transcendentals=0,
                                      bytes_accessed=bytes_accessed),
    )(x_slab, T1, b1t, T2, btt)

    # Row m holds [y[2m] | y[2m+1]] lane-flattened: a plain reshape gives NHWC.
    y_nhwc = out.reshape(N, 2 * H, 2 * W, Cout)
    # NOTE: skip this transpose (return NHWC) if the downstream consumer allows
    # it -- it is a full extra HBM pass done by XLA outside the kernel.
    return jnp.transpose(y_nhwc, (0, 3, 1, 2))                # NHWC -> NCHW


# ----------------------------------------------------------------------------
# Plain-JAX (XLA) reference reproducing the PyTorch forward pass
# ----------------------------------------------------------------------------
def reference_forward(x_nchw, params):
    dn = ('NCHW', 'OIHW', 'NCHW')
    hi = lax.Precision.HIGHEST
    h = lax.conv_general_dilated(x_nchw, params["w1"], (1, 1),
                                 ((1, 1), (1, 1)), dimension_numbers=dn,
                                 precision=hi)
    h = jnp.maximum(h + params["b1"][None, :, None, None], 0.0)
    w_flip = jnp.transpose(params["wt"], (1, 0, 2, 3))[:, :, ::-1, ::-1]
    y = lax.conv_general_dilated(h, w_flip, (1, 1), ((2, 2), (2, 2)),
                                 lhs_dilation=(2, 2), dimension_numbers=dn,
                                 precision=hi)
    y = jnp.maximum(y + params["bt"][None, :, None, None], 0.0)
    return y


if __name__ == "__main__":
    key = jax.random.PRNGKey(0)
    kx, kp = jax.random.split(key)

    N, in_ch, mid_ch, out_ch, H, W = 2, 4, 8, 4, 16, 16
    x = jax.random.normal(kx, (N, in_ch, H, W), jnp.float32)   # NCHW input
    params = init_params(kp, in_ch, mid_ch, out_ch)

    ref = jax.block_until_ready(reference_forward(x, params))

    fwd = jax.jit(decoder_block_v2_forward)

    # f32 operand path (default; v5e-friendly, matches reference to ~1e-3).
    prep_f32 = prepare_params(params, W, compute_dtype=jnp.float32)
    out = jax.block_until_ready(fwd(x, prep_f32))
    assert out.shape == (N, out_ch, 2 * H, 2 * W), out.shape
    np.testing.assert_allclose(np.asarray(out), np.asarray(ref),
                               rtol=1e-3, atol=1e-3)

    # bf16 operand path (v6e/v7x bf16-native MXU; f32 accumulation).
    prep_bf16 = prepare_params(params, W, compute_dtype=jnp.bfloat16)
    out_bf16 = jax.block_until_ready(fwd(x, prep_bf16))
    np.testing.assert_allclose(np.asarray(out_bf16), np.asarray(ref),
                               rtol=5e-2, atol=5e-2)

    print("KERNEL_OK")
</pallas_src>

<mosaic_0001>
module attributes {stable_mosaic.version = 11 : i64} {
  func.func @kernel(%arg0: i32, %arg1: memref<36x64xf32, #tpu.memory_space<vmem>>, %arg2: memref<3x64x128xf32, #tpu.memory_space<vmem>>, %arg3: memref<1x128xf32, #tpu.memory_space<vmem>>, %arg4: memref<2x2x128x128xf32, #tpu.memory_space<vmem>>, %arg5: memref<1x128xf32, #tpu.memory_space<vmem>>, %arg6: memref<2x16x256xf32, #tpu.memory_space<vmem>>, %arg7: memref<36x128xf32, #tpu.memory_space<vmem>>) attributes {dimension_semantics = [#tpu.dimension_semantics<arbitrary>], iteration_bounds = array<i64: 1>, scalar_prefetch = 0 : i64, scratch_operands = 1 : i64, tpu.core_type = #tpu.core_type<tc>, window_params = [{pipeline_mode = #tpu.pipeline_mode<synchronous>, transform_indices = @transform_0, window_bounds = array<i64: 36, 64>}, {pipeline_mode = #tpu.pipeline_mode<synchronous>, transform_indices = @transform_1, window_bounds = array<i64: 3, 64, 128>}, {pipeline_mode = #tpu.pipeline_mode<synchronous>, transform_indices = @transform_2, window_bounds = array<i64: 1, 128>}, {pipeline_mode = #tpu.pipeline_mode<synchronous>, transform_indices = @transform_3, window_bounds = array<i64: 2, 2, 128, 128>}, {pipeline_mode = #tpu.pipeline_mode<synchronous>, transform_indices = @transform_4, window_bounds = array<i64: 1, 128>}, {pipeline_mode = #tpu.pipeline_mode<synchronous>, transform_indices = @transform_5, window_bounds = array<i64: 2, 16, 256>}]} {
    %c0 = arith.constant 0 : index
    %c0_0 = arith.constant 0 : index
    %0 = vector.load %arg1[%c0, %c0_0] : memref<36x64xf32, #tpu.memory_space<vmem>>, vector<34x64xf32>
    %c0_1 = arith.constant 0 : index
    %c0_2 = arith.constant 0 : index
    %c0_3 = arith.constant 0 : index
    %1 = vector.load %arg2[%c0_1, %c0_2, %c0_3] : memref<3x64x128xf32, #tpu.memory_space<vmem>>, vector<1x64x128xf32>
    %2 = vector.shape_cast %1 : vector<1x64x128xf32> to vector<64x128xf32>
    %cst = arith.constant dense<0.000000e+00> : vector<34x128xf32>
    %3 = tpu.matmul %0, %2, %cst {dimension_numbers = #tpu.dot_dimension_numbers<[1], [0], [0], [1], [0, 0, 1, 1], [], []>} : vector<34x64xf32>, vector<64x128xf32>, vector<34x128xf32> -> vector<34x128xf32>
    %c1 = arith.constant 1 : index
    %c0_4 = arith.constant 0 : index
    %4 = vector.load %arg1[%c1, %c0_4] : memref<36x64xf32, #tpu.memory_space<vmem>>, vector<34x64xf32>
    %c1_5 = arith.constant 1 : index
    %c0_6 = arith.constant 0 : index
    %c0_7 = arith.constant 0 : index
    %5 = vector.load %arg2[%c1_5, %c0_6, %c0_7] : memref<3x64x128xf32, #tpu.memory_space<vmem>>, vector<1x64x128xf32>
    %6 = vector.shape_cast %5 : vector<1x64x128xf32> to vector<64x128xf32>
    %cst_8 = arith.constant dense<0.000000e+00> : vector<34x128xf32>
    %7 = tpu.matmul %4, %6, %cst_8 {dimension_numbers = #tpu.dot_dimension_numbers<[1], [0], [0], [1], [0, 0, 1, 1], [], []>} : vector<34x64xf32>, vector<64x128xf32>, vector<34x128xf32> -> vector<34x128xf32>
    %8 = arith.addf %3, %7 : vector<34x128xf32>
    %c2 = arith.constant 2 : index
    %c0_9 = arith.constant 0 : index
    %9 = vector.load %arg1[%c2, %c0_9] : memref<36x64xf32, #tpu.memory_space<vmem>>, vector<34x64xf32>
    %c2_10 = arith.constant 2 : index
    %c0_11 = arith.constant 0 : index
    %c0_12 = arith.constant 0 : index
    %10 = vector.load %arg2[%c2_10, %c0_11, %c0_12] : memref<3x64x128xf32, #tpu.memory_space<vmem>>, vector<1x64x128xf32>
    %11 = vector.shape_cast %10 : vector<1x64x128xf32> to vector<64x128xf32>
    %cst_13 = arith.constant dense<0.000000e+00> : vector<34x128xf32>
    %12 = tpu.matmul %9, %11, %cst_13 {dimension_numbers = #tpu.dot_dimension_numbers<[1], [0], [0], [1], [0, 0, 1, 1], [], []>} : vector<34x64xf32>, vector<64x128xf32>, vector<34x128xf32> -> vector<34x128xf32>
    %13 = arith.addf %8, %12 : vector<34x128xf32>
    %c0_14 = arith.constant 0 : index
    %c0_15 = arith.constant 0 : index
    %14 = vector.load %arg3[%c0_14, %c0_15] : memref<1x128xf32, #tpu.memory_space<vmem>>, vector<1x128xf32>
    %15 = vector.broadcast %14 : vector<1x128xf32> to vector<34x128xf32>
    %16 = arith.addf %13, %15 : vector<34x128xf32>
    %cst_16 = arith.constant 0.000000e+00 : f32
    %17 = vector.broadcast %cst_16 : f32 to vector<34x128xf32>
    %18 = arith.maximumf %16, %17 : vector<34x128xf32>
    %c1_17 = arith.constant 1 : index
    %c0_18 = arith.constant 0 : index
    %19 = vector.load %arg7[%c1_17, %c0_18] : memref<36x128xf32, #tpu.memory_space<vmem>>, vector<34x128xf32>
    tpu.vector_store %arg7[%c1_17, %c0_18], %18 {strides = array<i32>} : memref<36x128xf32, #tpu.memory_space<vmem>>, vector<34x128xf32>,
    %cst_19 = arith.constant 0.000000e+00 : f32
    %20 = vector.broadcast %cst_19 : f32 to vector<1x128xf32>
    %c0_20 = arith.constant 0 : index
    %c0_21 = arith.constant 0 : index
    %21 = vector.load %arg7[%c0_20, %c0_21] : memref<36x128xf32, #tpu.memory_space<vmem>>, vector<1x128xf32>
    tpu.vector_store %arg7[%c0_20, %c0_21], %20 {strides = array<i32>} : memref<36x128xf32, #tpu.memory_space<vmem>>, vector<1x128xf32>,
    %c17 = arith.constant 17 : index
    %c0_22 = arith.constant 0 : index
    %22 = vector.load %arg7[%c17, %c0_22] : memref<36x128xf32, #tpu.memory_space<vmem>>, vector<1x128xf32>
    tpu.vector_store %arg7[%c17, %c0_22], %20 {strides = array<i32>} : memref<36x128xf32, #tpu.memory_space<vmem>>, vector<1x128xf32>,
    %c18 = arith.constant 18 : index
    %c0_23 = arith.constant 0 : index
    %23 = vector.load %arg7[%c18, %c0_23] : memref<36x128xf32, #tpu.memory_space<vmem>>, vector<1x128xf32>
    tpu.vector_store %arg7[%c18, %c0_23], %20 {strides = array<i32>} : memref<36x128xf32, #tpu.memory_space<vmem>>, vector<1x128xf32>,
    %c35 = arith.constant 35 : index
    %c0_24 = arith.constant 0 : index
    %24 = vector.load %arg7[%c35, %c0_24] : memref<36x128xf32, #tpu.memory_space<vmem>>, vector<1x128xf32>
    tpu.vector_store %arg7[%c35, %c0_24], %20 {strides = array<i32>} : memref<36x128xf32, #tpu.memory_space<vmem>>, vector<1x128xf32>,
    %c0_25 = arith.constant 0 : index
    %c0_26 = arith.constant 0 : index
    %25 = vector.load %arg7[%c0_25, %c0_26] : memref<36x128xf32, #tpu.memory_space<vmem>>, vector<34x128xf32>
    %c0_27 = arith.constant 0 : index
    %c0_28 = arith.constant 0 : index
    %c0_29 = arith.constant 0 : index
    %c0_30 = arith.constant 0 : index
    %26 = vector.load %arg4[%c0_27, %c0_28, %c0_29, %c0_30] : memref<2x2x128x128xf32, #tpu.memory_space<vmem>>, vector<1x1x128x128xf32>
    %27 = vector.shape_cast %26 : vector<1x1x128x128xf32> to vector<128x128xf32>
    %cst_31 = arith.constant dense<0.000000e+00> : vector<34x128xf32>
    %28 = tpu.matmul %25, %27, %cst_31 {dimension_numbers = #tpu.dot_dimension_numbers<[1], [0], [0], [1], [0, 0, 1, 1], [], []>} : vector<34x128xf32>, vector<128x128xf32>, vector<34x128xf32> -> vector<34x128xf32>
    %c1_32 = arith.constant 1 : index
    %c0_33 = arith.constant 0 : index
    %29 = vector.load %arg7[%c1_32, %c0_33] : memref<36x128xf32, #tpu.memory_space<vmem>>, vector<34x128xf32>
    %c0_34 = arith.constant 0 : index
    %c1_35 = arith.constant 1 : index
    %c0_36 = arith.constant 0 : index
    %c0_37 = arith.constant 0 : index
    %30 = vector.load %arg4[%c0_34, %c1_35, %c0_36, %c0_37] : memref<2x2x128x128xf32, #tpu.memory_space<vmem>>, vector<1x1x128x128xf32>
    %31 = vector.shape_cast %30 : vector<1x1x128x128xf32> to vector<128x128xf32>
    %cst_38 = arith.constant dense<0.000000e+00> : vector<34x128xf32>
    %32 = tpu.matmul %29, %31, %cst_38 {dimension_numbers = #tpu.dot_dimension_numbers<[1], [0], [0], [1], [0, 0, 1, 1], [], []>} : vector<34x128xf32>, vector<128x128xf32>, vector<34x128xf32> -> vector<34x128xf32>
    %33 = arith.addf %28, %32 : vector<34x128xf32>
    %c0_39 = arith.constant 0 : index
    %c0_40 = arith.constant 0 : index
    %34 = vector.load %arg5[%c0_39, %c0_40] : memref<1x128xf32, #tpu.memory_space<vmem>>, vector<1x128xf32>
    %35 = vector.broadcast %34 : vector<1x128xf32> to vector<34x128xf32>
    %36 = arith.addf %33, %35 : vector<34x128xf32>
    %cst_41 = arith.constant 0.000000e+00 : f32
    %37 = vector.broadcast %cst_41 : f32 to vector<34x128xf32>
    %38 = arith.maximumf %36, %37 : vector<34x128xf32>
    %39 = vector.extract_strided_slice %38 {offsets = [0, 0], sizes = [16, 128], strides = [1, 1]} : vector<34x128xf32> to vector<16x128xf32>
    %c0_42 = arith.constant 0 : index
    %c0_43 = arith.constant 0 : index
    %c0_44 = arith.constant 0 : index
    %40 = vector.load %arg6[%c0_42, %c0_43, %c0_44] : memref<2x16x256xf32, #tpu.memory_space<vmem>>, vector<1x16x128xf32>
    %41 = vector.shape_cast %40 : vector<1x16x128xf32> to vector<16x128xf32>
    %42 = vector.shape_cast %39 : vector<16x128xf32> to vector<1x16x128xf32>
    tpu.vector_store %arg6[%c0_42, %c0_43, %c0_44], %42 {strides = array<i32>} : memref<2x16x256xf32, #tpu.memory_space<vmem>>, vector<1x16x128xf32>,
    %43 = vector.extract_strided_slice %38 {offsets = [18, 0], sizes = [16, 128], strides = [1, 1]} : vector<34x128xf32> to vector<16x128xf32>
    %c1_45 = arith.constant 1 : index
    %c0_46 = arith.constant 0 : index
    %c0_47 = arith.constant 0 : index
    %44 = vector.load %arg6[%c1_45, %c0_46, %c0_47] : memref<2x16x256xf32, #tpu.memory_space<vmem>>, vector<1x16x128xf32>
    %45 = vector.shape_cast %44 : vector<1x16x128xf32> to vector<16x128xf32>
    %46 = vector.shape_cast %43 : vector<16x128xf32> to vector<1x16x128xf32>
    tpu.vector_store %arg6[%c1_45, %c0_46, %c0_47], %46 {strides = array<i32>} : memref<2x16x256xf32, #tpu.memory_space<vmem>>, vector<1x16x128xf32>,
    %c1_48 = arith.constant 1 : index
    %c0_49 = arith.constant 0 : index
    %47 = vector.load %arg7[%c1_48, %c0_49] : memref<36x128xf32, #tpu.memory_space<vmem>>, vector<34x128xf32>
    %c1_50 = arith.constant 1 : index
    %c0_51 = arith.constant 0 : index
    %c0_52 = arith.constant 0 : index
    %c0_53 = arith.constant 0 : index
    %48 = vector.load %arg4[%c1_50, %c0_51, %c0_52, %c0_53] : memref<2x2x128x128xf32, #tpu.memory_space<vmem>>, vector<1x1x128x128xf32>
    %49 = vector.shape_cast %48 : vector<1x1x128x128xf32> to vector<128x128xf32>
    %cst_54 = arith.constant dense<0.000000e+00> : vector<34x128xf32>
    %50 = tpu.matmul %47, %49, %cst_54 {dimension_numbers = #tpu.dot_dimension_numbers<[1], [0], [0], [1], [0, 0, 1, 1], [], []>} : vector<34x128xf32>, vector<128x128xf32>, vector<34x128xf32> -> vector<34x128xf32>
    %c2_55 = arith.constant 2 : index
    %c0_56 = arith.constant 0 : index
    %51 = vector.load %arg7[%c2_55, %c0_56] : memref<36x128xf32, #tpu.memory_space<vmem>>, vector<34x128xf32>
    %c1_57 = arith.constant 1 : index
    %c1_58 = arith.constant 1 : index
    %c0_59 = arith.constant 0 : index
    %c0_60 = arith.constant 0 : index
    %52 = vector.load %arg4[%c1_57, %c1_58, %c0_59, %c0_60] : memref<2x2x128x128xf32, #tpu.memory_space<vmem>>, vector<1x1x128x128xf32>
    %53 = vector.shape_cast %52 : vector<1x1x128x128xf32> to vector<128x128xf32>
    %cst_61 = arith.constant dense<0.000000e+00> : vector<34x128xf32>
    %54 = tpu.matmul %51, %53, %cst_61 {dimension_numbers = #tpu.dot_dimension_numbers<[1], [0], [0], [1], [0, 0, 1, 1], [], []>} : vector<34x128xf32>, vector<128x128xf32>, vector<34x128xf32> -> vector<34x128xf32>
    %55 = arith.addf %50, %54 : vector<34x128xf32>
    %c0_62 = arith.constant 0 : index
    %c0_63 = arith.constant 0 : index
    %56 = vector.load %arg5[%c0_62, %c0_63] : memref<1x128xf32, #tpu.memory_space<vmem>>, vector<1x128xf32>
    %57 = vector.broadcast %56 : vector<1x128xf32> to vector<34x128xf32>
    %58 = arith.addf %55, %57 : vector<34x128xf32>
    %cst_64 = arith.constant 0.000000e+00 : f32
    %59 = vector.broadcast %cst_64 : f32 to vector<34x128xf32>
    %60 = arith.maximumf %58, %59 : vector<34x128xf32>
    %61 = vector.extract_strided_slice %60 {offsets = [0, 0], sizes = [16, 128], strides = [1, 1]} : vector<34x128xf32> to vector<16x128xf32>
    %c0_65 = arith.constant 0 : index
    %c0_66 = arith.constant 0 : index
    %c128 = arith.constant 128 : index
    %62 = vector.load %arg6[%c0_65, %c0_66, %c128] : memref<2x16x256xf32, #tpu.memory_space<vmem>>, vector<1x16x128xf32>
    %63 = vector.shape_cast %62 : vector<1x16x128xf32> to vector<16x128xf32>
    %64 = vector.shape_cast %61 : vector<16x128xf32> to vector<1x16x128xf32>
    tpu.vector_store %arg6[%c0_65, %c0_66, %c128], %64 {strides = array<i32>} : memref<2x16x256xf32, #tpu.memory_space<vmem>>, vector<1x16x128xf32>,
    %65 = vector.extract_strided_slice %60 {offsets = [18, 0], sizes = [16, 128], strides = [1, 1]} : vector<34x128xf32> to vector<16x128xf32>
    %c1_67 = arith.constant 1 : index
    %c0_68 = arith.constant 0 : index
    %c128_69 = arith.constant 128 : index
    %66 = vector.load %arg6[%c1_67, %c0_68, %c128_69] : memref<2x16x256xf32, #tpu.memory_space<vmem>>, vector<1x16x128xf32>
    %67 = vector.shape_cast %66 : vector<1x16x128xf32> to vector<16x128xf32>
    %68 = vector.shape_cast %65 : vector<16x128xf32> to vector<1x16x128xf32>
    tpu.vector_store %arg6[%c1_67, %c0_68, %c128_69], %68 {strides = array<i32>} : memref<2x16x256xf32, #tpu.memory_space<vmem>>, vector<1x16x128xf32>,
    return
  }
  func.func @transform_0(%arg0: i32) -> (i32, i32) {
    %c0_i32 = arith.constant 0 : i32
    %c0_i32_0 = arith.constant 0 : i32
    %c0_i32_1 = arith.constant 0 : i32
    return %c0_i32, %c0_i32_0 : i32, i32
  }
  func.func @transform_1(%arg0: i32) -> (i32, i32, i32) {
    %c0_i32 = arith.constant 0 : i32
    %c0_i32_0 = arith.constant 0 : i32
    %c0_i32_1 = arith.constant 0 : i32
    %c0_i32_2 = arith.constant 0 : i32
    return %c0_i32, %c0_i32_0, %c0_i32_1 : i32, i32, i32
  }
  func.func @transform_2(%arg0: i32) -> (i32, i32) {
    %c0_i32 = arith.constant 0 : i32
    %c0_i32_0 = arith.constant 0 : i32
    %c0_i32_1 = arith.constant 0 : i32
    return %c0_i32, %c0_i32_0 : i32, i32
  }
  func.func @transform_3(%arg0: i32) -> (i32, i32, i32, i32) {
    %c0_i32 = arith.constant 0 : i32
    %c0_i32_0 = arith.constant 0 : i32
    %c0_i32_1 = arith.constant 0 : i32
    %c0_i32_2 = arith.constant 0 : i32
    %c0_i32_3 = arith.constant 0 : i32
    return %c0_i32, %c0_i32_0, %c0_i32_1, %c0_i32_2 : i32, i32, i32, i32
  }
  func.func @transform_4(%arg0: i32) -> (i32, i32) {
    %c0_i32 = arith.constant 0 : i32
    %c0_i32_0 = arith.constant 0 : i32
    %c0_i32_1 = arith.constant 0 : i32
    return %c0_i32, %c0_i32_0 : i32, i32
  }
  func.func @transform_5(%arg0: i32) -> (i32, i32, i32) {
    %c0_i32 = arith.constant 0 : i32
    %c0_i32_0 = arith.constant 0 : i32
    %c0_i32_1 = arith.constant 0 : i32
    %c0_i32_2 = arith.constant 0 : i32
    return %c0_i32, %c0_i32_0, %c0_i32_1 : i32, i32, i32
  }
}

</mosaic_0001>

<bundles_post_ra>
// kernel: decoder_block_v2_forward.1
= control target key start
LH: loop header
LB: loop body
LE: loop exit
PB: predicated region body
PF: predicated region fallthrough
CT: control target
= control target key end

     0   :  { %10 = vsyncpa [#allocation4], 0  ;;  %s1582_s18 = smov [#allocation3]   ;;  %s2079_s0 = inlined_call_operand.vmem [shape: f32[36,64], index: 0, kind: input, shape index: {}]   ;;  %s2080_s1 = inlined_call_operand.hbm [shape: f32[3,64,128], index: 1, kind: input, shape index: {}]   ;;  %s2081_s2 = inlined_call_operand.vmem [shape: f32[1,128], index: 2, kind: input, shape index: {}]   ;;  %s2082_s3 = inlined_call_operand.vmem [shape: f32[2,2,128,128], index: 3, kind: input, shape index: {}]   ;;  %s2083_s4 = inlined_call_operand.vmem [shape: f32[1,128], index: 4, kind: input, shape index: {}]   ;;  %s2084_s5 = inlined_call_operand.vmem [shape: f32[2,16,256], index: 5, kind: output, shape index: {}]  }
   0x1   :  { %s18_s19 = sshll.u32 %s1582_s18, 4  ;;  %s1558_s22 = scalar_lea.hbm %s2080_s1, 3072  ;;  %s19_s19 = int_to_ptr.vmem [resolvable:$true] %s18_s19 }
   0x2   :  { %p1559_p0 = scmp.ne.s32.totalorder %s2080_s1, %s1558_s22  ;;  %p1562_p1 = scmp.lt.u32.totalorder %s1558_s22, %s2080_s1 }
   0x4   :  { %p1564_p2 = pnand %p1562_p1, %p1559_p0 }
   0x6   :  { %1567 = shalt.err (!%p1564_p2)
}
   0x7   :  { %s1568_s27 = scalar_lea.vmem %s19_s19, 3072  ;;  %p1573_p4 = scmp.lt.s32.totalorder %s19_s19, %s19_s19 }
   0x8   :  { %p1569_p3 = scmp.ne.s32.totalorder %s19_s19, %s1568_s27  ;;  %p1574_p5 = scmp.lt.s32.totalorder %s1568_s27, %s1568_s27 }
   0xa   :  { %p1575_p6 = por %p1574_p5, %p1573_p4 }
   0xc   :  { %p1576_p7 = pnand %p1575_p6, %p1569_p3 }
   0xe   :  { %1579 = shalt.err (!%p1576_p7)
}
   0xf   :  { %s1583_s28 = smov 128   ;;  %s1584_s29 = smov 8  }
  0x10   :  { %24 = dma.hbm_to_vmem [thread:$0]  %s2080_s1, 3072, %s19_s19, [#allocation4], %s1583_s28, %s1583_s28, %s1584_s29  }
  0x11   :  { %1580 = dma.done.wait [#allocation4], 3072  }
  0x12   :  { %1581 = vsyncadd [#allocation4], 4294964224  ;;  %v1585_v0 = vmov 0.0|0.0   ;;  %v1586_v1 = vmov 0.0   ;;  %vm1587_vm0 = vmmov 0   ;;  %v53_v2 = vld [vmem:[#allocation3 + $0x40] sm:$0xff] }
  0x13   :  { %1544 = vmatprep.subr.bf16.mxu1 %v1585_v0  ;;  %1412 = vmatprep.subr.bf16.mxu0 %v1585_v0  ;;  %418 = vst [vmem:[#allocation2] sm:$0x1] %v1586_v1  ;;  %421 = vst [vmem:[#allocation2 + $0x23] sm:$0x1] %v1586_v1  ;;  %v54_v3 = vld [vmem:[#allocation3 + $0x48] sm:$0xff]  ;;  %v55_v4 = vld [vmem:[#allocation3 + $0x50] sm:$0xff] }
  0x14   :  { %1159 = vmatprep.mubr.msk.f32.mxu1 %vm1587_vm0, %v1586_v1  ;;  %1147 = vmatprep.mubr.msk.f32.mxu0 %vm1587_vm0, %v1586_v1  ;;  %v1413_v5 = vpack.c.bf16 %v54_v3, %v53_v2  ;;  %v56_v6 = vld [vmem:[#allocation3 + $0x58] sm:$0xff]  ;;  %v57_v8 = vld [vmem:[#allocation3 + $0x60] sm:$0xff]  ;;  %v58_v9 = vld [vmem:[#allocation3 + $0x68] sm:$0xff]  ;;  %vm61_vm1 = vcmask 523264   ;;  %vm667_vm2 = vcmask 1045504  }
  0x15   :  { %v1416_v7 = vpack.c.bf16 %v56_v6, %v55_v4  ;;  %v1419_v10 = vpack.c.bf16 %v58_v9, %v57_v8  ;;  %v59_v11 = vld [vmem:[#allocation3 + $0x70] sm:$0xff]  ;;  %v60_v12 = vld [vmem:[#allocation3 + $0x78] sm:$0xff]  ;;  %v39_v14 = vld [vmem:[#allocation3] sm:$0xff] }
  0x16   :  { %1548 = vmatpush3.bf16.msra.mxu1 %v1413_v5  ;;  %1414 = vmatpush3.bf16.msra.mxu0 %v1413_v5  ;;  %v1422_v13 = vpack.c.bf16 %v60_v12, %v59_v11  ;;  %v40_v15 = vld [vmem:[#allocation3 + $0x8] sm:$0xff]  ;;  %v278_v16 = vld [vmem:[#allocation3 + $0x80] sm:$0xff]  ;;  %v51_v18 = vld [vmem:[%s2079_s0 + $0x21] sm:$0x3] }
  0x17   :  { %1545 = vmatprep.subr.bf16.mxu1 %v1585_v0  ;;  %1415 = vmatprep.subr.bf16.mxu0 %v1585_v0  ;;  %v279_v17 = vld [vmem:[#allocation3 + $0x88] sm:$0xff]  ;;  %v47_v19 = vld [vmem:[%s2079_s0 + $0x1] sm:$0xff]  ;;  %v1425_v20 = vpack.c.bf16 %v40_v15, %v39_v14  ;;  %v41_v22 = vld [vmem:[#allocation3 + $0x10] sm:$0xff] }
  0x18   :  { %v1437_v21 = vpack.c.bf16 %v279_v17, %v278_v16  ;;  %v42_v23 = vld [vmem:[#allocation3 + $0x18] sm:$0xff]  ;;  %v280_v24 = vld [vmem:[#allocation3 + $0x90] sm:$0xff]  ;;  %v48_v26 = vld [vmem:[%s2079_s0 + $0x9] sm:$0xff] }
  0x19   :  { %v281_v25 = vld [vmem:[#allocation3 + $0x98] sm:$0xff]  ;;  %v1428_v27 = vpack.c.bf16 %v42_v23, %v41_v22  ;;  %v43_v29 = vld [vmem:[#allocation3 + $0x20] sm:$0xff]  ;;  %v44_v30 = vld [vmem:[#allocation3 + $0x28] sm:$0xff] }
  0x1a   :  { %1549 = vmatpush3.bf16.msra.mxu1 %v1416_v7  ;;  %1417 = vmatpush3.bf16.msra.mxu0 %v1416_v7  ;;  %v1440_v28 = vpack.c.bf16 %v281_v25, %v280_v24  ;;  %v282_v31 = vld [vmem:[#allocation3 + $0xa0] sm:$0xff]  ;;  %v283_v32 = vld [vmem:[#allocation3 + $0xa8] sm:$0xff]  ;;  %v1431_v34 = vpack.c.bf16 %v44_v30, %v43_v29  ;;  %v45_v36 = vld [vmem:[#allocation3 + $0x30] sm:$0xff] }
  0x1b   :  { %1546 = vmatprep.subr.bf16.mxu1 %v1585_v0  ;;  %1418 = vmatprep.subr.bf16.mxu0 %v1585_v0  ;;  %v49_v33 = vld [vmem:[%s2079_s0 + $0x11] sm:$0xff]  ;;  %v1443_v35 = vpack.c.bf16 %v283_v32, %v282_v31  ;;  %v46_v37 = vld [vmem:[#allocation3 + $0x38] sm:$0xff]  ;;  %v35_v45 = vld [vmem:[%s2079_s0 + $0x8] sm:$0xff] }
  0x1c   :  { %v284_v38 = vld [vmem:[#allocation3 + $0xb0] sm:$0xff]  ;;  %v285_v39 = vld [vmem:[#allocation3 + $0xb8] sm:$0xff]  ;;  %v1434_v41 = vpack.c.bf16 %v46_v37, %v45_v36  ;;  %v273_v46 = vld [vmem:[%s2079_s0 + $0xa] sm:$0xff] }
  0x1d   :  { %v50_v40 = vld [vmem:[%s2079_s0 + $0x19] sm:$0xff]  ;;  %v1446_v42 = vpack.c.bf16 %v285_v39, %v284_v38  ;;  %v272_v44 = vld [vmem:[%s2079_s0 + $0x2] sm:$0xff]  ;;  %v36_v47 = vld [vmem:[%s2079_s0 + $0x10] sm:$0xff] }
  0x1e   :  { %1550 = vmatpush3.bf16.msra.mxu1 %v1419_v10  ;;  %1420 = vmatpush3.bf16.msra.mxu0 %v1419_v10  ;;  %v34_v43 = vld [vmem:[%s2079_s0] sm:$0xff]  ;;  %v274_v48 = vld [vmem:[%s2079_s0 + $0x12] sm:$0xff]  ;;  %v955_v54 = vld [vmem:[%s2082_s3 + $0x88] sm:$0xff] }
  0x1f   :  { %1547 = vmatprep.subr.bf16.mxu1 %v1585_v0  ;;  %1421 = vmatprep.subr.bf16.mxu0 %v1585_v0  ;;  %v37_v49 = vld [vmem:[%s2079_s0 + $0x18] sm:$0xff]  ;;  %v38_v51 = vld [vmem:[%s2079_s0 + $0x20] sm:$0x3]  ;;  %v276_v52 = vld [vmem:[%s2079_s0 + $0x22] sm:$0x3] }
  0x20   :  { %v275_v50 = vld [vmem:[%s2079_s0 + $0x1a] sm:$0xff]  ;;  %v956_v56 = vld [vmem:[%s2082_s3 + $0x90] sm:$0xff]  ;;  %v428_v60 = vld [vmem:[%s2082_s3 + $0x8] sm:$0xff] }
  0x21   :  { %v954_v53 = vld [vmem:[%s2082_s3 + $0x80] sm:$0xff]  ;;  %v957_v57 = vld [vmem:[%s2082_s3 + $0x98] sm:$0xff]  ;;  %v959_v63 = vld [vmem:[%s2082_s3 + $0xa8] sm:$0xff] }
  0x22   :  { %1551 = vmatpush3.bf16.msra.mxu1 %v1422_v13  ;;  %1423 = vmatpush3.bf16.msra.mxu0 %v1422_v13  ;;  %v1449_v55 = vpack.c.bf16 %v955_v54, %v954_v53  ;;  %v1452_v58 = vpack.c.bf16 %v957_v57, %v956_v56  ;;  %v427_v59 = vld [vmem:[%s2082_s3] sm:$0xff]  ;;  %v429_v3 = vld [vmem:[%s2082_s3 + $0x10] sm:$0xff]  ;;  %v430_v4 = vld [vmem:[%s2082_s3 + $0x18] sm:$0xff] }
  0x23   :  { %1424 = vmatprep.subr.bf16.mxu1 %v1585_v0  ;;  %1436 = vmatprep.subr.bf16.mxu0 %v1585_v0  ;;  %v958_v61 = vld [vmem:[%s2082_s3 + $0xa0] sm:$0xff]  ;;  %v1473_v62 = vpack.c.bf16 %v428_v60, %v427_v59  ;;  %v960_v5 = vld [vmem:[%s2082_s3 + $0xb0] sm:$0xff]  ;;  %v1476_v6 = vpack.c.bf16 %v430_v4, %v429_v3  ;;  %v961_v7 = vld [vmem:[%s2082_s3 + $0xb8] sm:$0xff] }
  0x24   :  { %v1455_v2 = vpack.c.bf16 %v959_v63, %v958_v61  ;;  %v1458_v8 = vpack.c.bf16 %v961_v7, %v960_v5  ;;  %v431_v9 = vld [vmem:[%s2082_s3 + $0x20] sm:$0xff]  ;;  %v432_v10 = vld [vmem:[%s2082_s3 + $0x28] sm:$0xff]  ;;  %v433_v15 = vld [vmem:[%s2082_s3 + $0x30] sm:$0xff] }
  0x25   :  { %1160 = vmatmul.mubr.msk.f32.vlgmr.msra.gmra.mrb[0].mxu1 %vm61_vm1, %v51_v18  ;;  %1148 = vmatmul.mubr.msk.f32.vlgmr.msra.gmra.mrb[0].mxu0 %vm61_vm1, %v47_v19  ;;  %v962_v11 = vld [vmem:[%s2082_s3 + $0xc0] sm:$0xff]  ;;  %v1479_v12 = vpack.c.bf16 %v432_v10, %v431_v9  ;;  %v963_v13 = vld [vmem:[%s2082_s3 + $0xc8] sm:$0xff]  ;;  %v434_v16 = vld [vmem:[%s2082_s3 + $0x38] sm:$0xff] }
  0x26   :  { %1426 = vmatpush3.bf16.msra.mxu1 %v1425_v20  ;;  %1438 = vmatpush3.bf16.msra.mxu0 %v1437_v21  ;;  %v1461_v14 = vpack.c.bf16 %v963_v13, %v962_v11  ;;  %v964_v17 = vld [vmem:[%s2082_s3 + $0xd0] sm:$0xff]  ;;  %v1482_v18 = vpack.c.bf16 %v434_v16, %v433_v15  ;;  %v965_v19 = vld [vmem:[%s2082_s3 + $0xd8] sm:$0xff]  ;;  %v435_v21 = vld [vmem:[%s2082_s3 + $0x40] sm:$0xff] }
  0x27   :  { %1150 = vmatprep.mubr.msk.f32.mxu0 %vm1587_vm0, %v1586_v1  ;;  %1427 = vmatprep.subr.bf16.mxu1 %v1585_v0  ;;  %v1464_v20 = vpack.c.bf16 %v965_v19, %v964_v17  ;;  %v436_v22 = vld [vmem:[%s2082_s3 + $0x48] sm:$0xff]  ;;  %v966_v23 = vld [vmem:[%s2082_s3 + $0xe0] sm:$0xff]  ;;  %v968_v29 = vld [vmem:[%s2082_s3 + $0xf0] sm:$0xff] }
  0x28   :  { %1439 = vmatprep.subr.bf16.mxu0 %v1585_v0  ;;  %1178 = vmatprep.mubr.msk.f32.mxu1 %vm1587_vm0, %v1586_v1  ;;  %v1485_v24 = vpack.c.bf16 %v436_v22, %v435_v21  ;;  %v967_v25 = vld [vmem:[%s2082_s3 + $0xe8] sm:$0xff]  ;;  %v969_v31 = vld [vmem:[%s2082_s3 + $0xf8] sm:$0xff]  ;;  %v441_v36 = vld [vmem:[%s2082_s3 + $0x70] sm:$0xff] }
  0x29   :  { %1151 = vmatmul.mubr.msk.f32.gmra.mrb[2].mxu0 %vm61_vm1, %v48_v26  ;;  %v1467_v26 = vpack.c.bf16 %v967_v25, %v966_v23  ;;  %v1470_v32 = vpack.c.bf16 %v969_v31, %v968_v29  ;;  %v442_v37 = vld [vmem:[%s2082_s3 + $0x78] sm:$0xff]  ;;  %v1861_v54 = vld [vmem:[%s2081_s2] ss:$0 sm:$0xff]  ;;  %v990_v57 = vld [vmem:[%s2082_s3 + $0x188] sm:$0xff] }
  0x2a   :  { %1429 = vmatpush3.bf16.msra.mxu1 %v1428_v27  ;;  %1441 = vmatpush3.bf16.msra.mxu0 %v1440_v28  ;;  %v437_v27 = vld [vmem:[%s2082_s3 + $0x50] sm:$0xff]  ;;  %v438_v28 = vld [vmem:[%s2082_s3 + $0x58] sm:$0xff]  ;;  %v1494_v38 = vpack.c.bf16 %v442_v37, %v441_v36  ;;  %v989_v56 = vld [vmem:[%s2082_s3 + $0x180] sm:$0xff] }
  0x2b   :  { %1153 = vmatprep.mubr.msk.f32.mxu0 %vm1587_vm0, %v1586_v1  ;;  %1430 = vmatprep.subr.bf16.mxu1 %v1585_v0  ;;  %v1488_v30 = vpack.c.bf16 %v438_v28, %v437_v27  ;;  %v991_v5 = vld [vmem:[%s2082_s3 + $0x190] sm:$0xff]  ;;  %v973_v16 = vld [vmem:[%s2082_s3 + $0x100] sm:$0xff]  ;;  %v974_v17 = vld [vmem:[%s2082_s3 + $0x108] sm:$0xff] }
  0x2c   :  { %1442 = vmatprep.subr.bf16.mxu0 %v1585_v0  ;;  %v994_v21 = vld [vmem:[%s2082_s3 + $0x1a8] sm:$0xff]  ;;  %v975_v29 = vld [vmem:[%s2082_s3 + $0x110] sm:$0xff]  ;;  %v996_v36 = vld [vmem:[%s2082_s3 + $0x1b8] sm:$0xff] }
  0x2d   :  { %1154 = vmatmul.mubr.msk.f32.gmra.mrb[4].mxu0 %vm61_vm1, %v49_v33  ;;  %v439_v33 = vld [vmem:[%s2082_s3 + $0x60] sm:$0xff] }
  0x2e   :  { %1432 = vmatpush3.bf16.msra.mxu1 %v1431_v34  ;;  %1444 = vmatpush3.bf16.msra.mxu0 %v1443_v35  ;;  %v440_v34 = vld [vmem:[%s2082_s3 + $0x68] sm:$0xff] }
  0x2f   :  { %1156 = vmatprep.mubr.msk.f32.mxu0 %vm1587_vm0, %v1586_v1  ;;  %1433 = vmatprep.subr.bf16.mxu1 %v1585_v0  ;;  %v1491_v35 = vpack.c.bf16 %v440_v34, %v439_v33 }
  0x30   :  { %1445 = vmatprep.subr.bf16.mxu0 %v1585_v0 }
  0x31   :  { %1157 = vmatmul.mubr.msk.f32.gmra.mrb[6].mxu0 %vm61_vm1, %v50_v40 }
  0x32   :  { %1435 = vmatpush3.bf16.msra.mxu1 %v1434_v41  ;;  %1447 = vmatpush3.bf16.msra.mxu0 %v1446_v42 }
  0x33   :  { %1209 = vmatprep.mubr.msk.f32.mxu0 %vm1587_vm0, %v1586_v1  ;;  %1448 = vmatprep.subr.bf16.mxu1 %v1585_v0 }
  0x34   :  { %1472 = vmatprep.subr.bf16.mxu0 %v1585_v0 }
  0x35   :  { %1179 = vmatmul.mubr.msk.f32.vlgmr.msra.gmra.mrb[2].mxu1 %vm61_vm1, %v34_v43  ;;  %1210 = vmatmul.mubr.msk.f32.vlgmr.msra.gmra.mrb[8].mxu0 %vm61_vm1, %v272_v44 }
  0x36   :  { %1181 = vmatprep.mubr.msk.f32.mxu1 %vm1587_vm0, %v1586_v1  ;;  %1212 = vmatprep.mubr.msk.f32.mxu0 %vm1587_vm0, %v1586_v1 }
  0x37   :  { %1450 = vmatpush3.bf16.msra.mxu1 %v1449_v55  ;;  %1474 = vmatpush3.bf16.msra.mxu0 %v1473_v62 }
  0x38   :  { %1451 = vmatprep.subr.bf16.mxu1 %v1585_v0  ;;  %1475 = vmatprep.subr.bf16.mxu0 %v1585_v0 }
  0x39   :  { %1182 = vmatmul.mubr.msk.f32.gmra.mrb[4].mxu1 %vm61_vm1, %v35_v45  ;;  %1213 = vmatmul.mubr.msk.f32.gmra.mrb[10].mxu0 %vm61_vm1, %v273_v46 }
  0x3a   :  { %1184 = vmatprep.mubr.msk.f32.mxu1 %vm1587_vm0, %v1586_v1  ;;  %1215 = vmatprep.mubr.msk.f32.mxu0 %vm1587_vm0, %v1586_v1 }
  0x3b   :  { %1453 = vmatpush3.bf16.msra.mxu1 %v1452_v58  ;;  %1477 = vmatpush3.bf16.msra.mxu0 %v1476_v6  ;;  %v992_v6 = vld [vmem:[%s2082_s3 + $0x198] sm:$0xff] }
  0x3c   :  { %1454 = vmatprep.subr.bf16.mxu1 %v1585_v0  ;;  %1478 = vmatprep.subr.bf16.mxu0 %v1585_v0  ;;  %v1500_v13 = vpack.c.bf16 %v992_v6, %v991_v5  ;;  %v984_v5 = vld [vmem:[%s2082_s3 + $0x158] sm:$0xff] }
  0x3d   :  { %1185 = vmatmul.mubr.msk.f32.gmra.mrb[6].mxu1 %vm61_vm1, %v36_v47  ;;  %1216 = vmatmul.mubr.msk.f32.gmra.mrb[12].mxu0 %vm61_vm1, %v274_v48 }
  0x3e   :  { %1187 = vmatprep.mubr.msk.f32.mxu1 %vm1587_vm0, %v1586_v1  ;;  %1218 = vmatprep.mubr.msk.f32.mxu0 %vm1587_vm0, %v1586_v1 }
  0x3f   :  { %1456 = vmatpush3.bf16.msra.mxu1 %v1455_v2  ;;  %1480 = vmatpush3.bf16.msra.mxu0 %v1479_v12  ;;  %v1497_v2 = vpack.c.bf16 %v990_v57, %v989_v56 }
  0x40   :  { %1457 = vmatprep.subr.bf16.mxu1 %v1585_v0  ;;  %1481 = vmatprep.subr.bf16.mxu0 %v1585_v0 }
  0x41   :  { %1188 = vmatmul.mubr.msk.f32.gmra.mrb[8].mxu1 %vm61_vm1, %v37_v49  ;;  %1219 = vmatmul.mubr.msk.f32.gmra.mrb[14].mxu0 %vm61_vm1, %v275_v50 }
  0x42   :  { %1190 = vmatprep.mubr.msk.f32.mxu1 %vm1587_vm0, %v1586_v1  ;;  %1221 = vmatprep.mubr.msk.f32.mxu0 %vm1587_vm0, %v1586_v1 }
  0x43   :  { %1459 = vmatpush3.bf16.msra.mxu1 %v1458_v8  ;;  %1483 = vmatpush3.bf16.msra.mxu0 %v1482_v18 }
  0x44   :  { %1460 = vmatprep.subr.bf16.mxu1 %v1585_v0  ;;  %1484 = vmatprep.subr.bf16.mxu0 %v1585_v0 }
  0x45   :  { %1191 = vmatmul.mubr.msk.f32.gmra.mrb[10].mxu1 %vm61_vm1, %v38_v51  ;;  %1222 = vmatmul.mubr.msk.f32.gmra.mrb[16].mxu0 %vm61_vm1, %v276_v52 }
  0x46   :  { %1256 = vmatprep.mubr.msk.f32.mxu1 %vm1587_vm0, %v1586_v1  ;;  %1303 = vmatprep.mubr.msk.f32.mxu0 %vm1587_vm0, %v1586_v1 }
  0x47   :  { %1462 = vmatpush3.bf16.msra.mxu1 %v1461_v14  ;;  %1486 = vmatpush3.bf16.msra.mxu0 %v1485_v24 }
  0x48   :  { %1463 = vmatprep.subr.bf16.mxu1 %v1585_v0  ;;  %1487 = vmatprep.subr.bf16.mxu0 %v1585_v0 }
  0x4b   :  { %1465 = vmatpush3.bf16.msra.mxu1 %v1464_v20  ;;  %1489 = vmatpush3.bf16.msra.mxu0 %v1488_v30  ;;  %v993_v20 = vld [vmem:[%s2082_s3 + $0x1a0] sm:$0xff]  ;;  %v976_v30 = vld [vmem:[%s2082_s3 + $0x118] sm:$0xff] }
  0x4c   :  { %1466 = vmatprep.subr.bf16.mxu1 %v1585_v0  ;;  %1490 = vmatprep.subr.bf16.mxu0 %v1585_v0  ;;  %v1503_v31 = vpack.c.bf16 %v994_v21, %v993_v20  ;;  %v988_v20 = vld [vmem:[%s2082_s3 + $0x178] sm:$0xff] }
  0x4f   :  { %1468 = vmatpush3.bf16.msra.mxu1 %v1467_v26  ;;  %1492 = vmatpush3.bf16.msra.mxu0 %v1491_v35  ;;  %v1521_v26 = vpack.c.bf16 %v974_v17, %v973_v16  ;;  %v995_v35 = vld [vmem:[%s2082_s3 + $0x1b0] sm:$0xff]  ;;  %v1004_v17 = vld [vmem:[%s2082_s3 + $0x1f8] sm:$0xff] }
  0x50   :  { %1469 = vmatprep.subr.bf16.mxu1 %v1585_v0  ;;  %1493 = vmatprep.subr.bf16.mxu0 %v1585_v0  ;;  %v1003_v16 = vld [vmem:[%s2082_s3 + $0x1f0] sm:$0xff] }
  0x51   :  { %v1518_v21 = vpack.c.bf16 %v1004_v17, %v1003_v16 }
  0x53   :  { %1471 = vmatpush3.bf16.msra.mxu1 %v1470_v32  ;;  %1495 = vmatpush3.bf16.msra.mxu0 %v1494_v38 }
  0x54   :  { %1496 = vmatprep.subr.bf16.mxu1 %v1585_v0  ;;  %1520 = vmatprep.subr.bf16.mxu0 %v1585_v0 }
  0xf8   :  { %v1856_v39 = vpop.f32.mrb[0].mxu1  ;;  %v143_v40 = vpop.f32.mrb[0].mxu0 }
  0xf9   :  { %v1161_v41 = vpop.f32.mrb[1].mxu1  ;;  %v1149_v42 = vpop.f32.mrb[1].mxu0 }
  0xfa   :  { %v1524_v42 = vpack.c.bf16 %v976_v30, %v975_v29 }
  0xfc   :  { %v148_v43 = vpop.f32.mrb[2].mxu0 }
  0xfd   :  { %v1152_v44 = vpop.f32.mrb[3].mxu0 }
 0x100   :  { %v153_v45 = vpop.f32.mrb[4].mxu0 }
 0x101   :  { %v1155_v46 = vpop.f32.mrb[5].mxu0 }
 0x102   :  { %v1506_v46 = vpack.c.bf16 %v996_v36, %v995_v35 }
 0x104   :  { %v158_v47 = vpop.f32.mrb[6].mxu0 }
 0x105   :  { %v1158_v48 = vpop.f32.mrb[7].mxu0 }
 0x108   :  { %v248_v49 = vpop.f32.mrb[2].mxu1  ;;  %v367_v50 = vpop.f32.mrb[8].mxu0 }
 0x109   :  { %v249_v51 = vadd.f32 %v248_v49, %v143_v40  ;;  %v1180_v52 = vpop.f32.mrb[3].mxu1  ;;  %v1211_v53 = vpop.f32.mrb[9].mxu0 }
 0x10a   :  { %v979_v53 = vld [vmem:[%s2082_s3 + $0x130] sm:$0xff] }
 0x10b   :  { %v391_v55 = vadd.f32 %v367_v50, %v249_v51  ;;  %v997_v50 = vld [vmem:[%s2082_s3 + $0x1c0] sm:$0xff]  ;;  %v998_v51 = vld [vmem:[%s2082_s3 + $0x1c8] sm:$0xff] }
 0x10c   :  { %v253_v58 = vpop.f32.mrb[4].mxu1  ;;  %v372_v59 = vpop.f32.mrb[10].mxu0  ;;  %v1509_v57 = vpack.c.bf16 %v998_v51, %v997_v50 }
 0x10d   :  { %v403_v60 = vadd.f32 %v1861_v54, %v391_v55  ;;  %v254_v61 = vadd.f32 %v253_v58, %v148_v43  ;;  %v1183_v62 = vpop.f32.mrb[5].mxu1  ;;  %v1214_v63 = vpop.f32.mrb[11].mxu0 }
 0x10e   :  { %v999_v62 = vld [vmem:[%s2082_s3 + $0x1d0] sm:$0xff]  ;;  %v1000_v63 = vld [vmem:[%s2082_s3 + $0x1d8] sm:$0xff] }
 0x10f   :  { %v1870_v3 = vmax.f32 %v403_v60, 0.0  ;;  %v392_v4 = vadd.f32 %v372_v59, %v254_v61  ;;  %v981_v59 = vld [vmem:[%s2082_s3 + $0x140] sm:$0xff]  ;;  %v982_v60 = vld [vmem:[%s2082_s3 + $0x148] sm:$0xff] }
 0x110   :  { %v258_v7 = vpop.f32.mrb[6].mxu1  ;;  %v377_v8 = vpop.f32.mrb[12].mxu0 }
 0x111   :  { %413 = vst [vmem:[#allocation2 + $0x1] sm:$0xff] %v1870_v3  ;;  %v404_v9 = vadd.f32 %v1861_v54, %v392_v4  ;;  %v259_v10 = vadd.f32 %v258_v7, %v153_v45  ;;  %v1186_v11 = vpop.f32.mrb[7].mxu1  ;;  %v1217_v12 = vpop.f32.mrb[13].mxu0  ;;  %1257 = vmatmul.mubr.f32.vlgmr.msra.gmra.mrb[12].mxu1 %v1870_v3  ;;  %v978_v45 = vld [vmem:[%s2082_s3 + $0x128] sm:$0xff]  ;;  %v983_v4 = vld [vmem:[%s2082_s3 + $0x150] sm:$0xff] }
 0x112   :  { %1498 = vmatpush3.bf16.msra.mxu1 %v1497_v2  ;;  %1259 = vmatprep.mubr.msk.f32.mxu1 %vm1587_vm0, %v1586_v1  ;;  %v1533_v2 = vpack.c.bf16 %v982_v60, %v981_v59  ;;  %v1536_v11 = vpack.c.bf16 %v984_v5, %v983_v4  ;;  %v985_v12 = vld [vmem:[%s2082_s3 + $0x160] sm:$0xff] }
 0x113   :  { %v1883_v14 = vmax.f32 %v404_v9, 0.0  ;;  %v393_v15 = vadd.f32 %v377_v8, %v259_v10  ;;  %1499 = vmatprep.subr.bf16.mxu1 %v1585_v0  ;;  %v1512_v8 = vpack.c.bf16 %v1000_v63, %v999_v62  ;;  %v1001_v9 = vld [vmem:[%s2082_s3 + $0x1e0] sm:$0xff]  ;;  %v1002_v10 = vld [vmem:[%s2082_s3 + $0x1e8] sm:$0xff] }
 0x114   :  { %v263_v18 = vpop.f32.mrb[8].mxu1  ;;  %v382_v19 = vpop.f32.mrb[14].mxu0 }
 0x115   :  { %414 = vst [vmem:[#allocation2 + $0x9] sm:$0xff] %v1883_v14  ;;  %v405_v22 = vadd.f32 %v1861_v54, %v393_v15  ;;  %v264_v23 = vadd.f32 %v263_v18, %v158_v47  ;;  %v1189_v24 = vpop.f32.mrb[9].mxu1  ;;  %v1220_v25 = vpop.f32.mrb[15].mxu0  ;;  %1260 = vmatmul.mubr.f32.gmra.mrb[14].mxu1 %v1883_v14  ;;  %v1515_v15 = vpack.c.bf16 %v1002_v10, %v1001_v9 }
 0x116   :  { %1501 = vmatpush3.bf16.msra.mxu1 %v1500_v13  ;;  %1262 = vmatprep.mubr.msk.f32.mxu1 %vm1587_vm0, %v1586_v1  ;;  %v986_v13 = vld [vmem:[%s2082_s3 + $0x168] sm:$0xff] }
 0x117   :  { %v410_v27 = vmax.f32 %v405_v22, 0.0  ;;  %v394_v28 = vadd.f32 %v382_v19, %v264_v23  ;;  %1502 = vmatprep.subr.bf16.mxu1 %v1585_v0  ;;  %v1539_v18 = vpack.c.bf16 %v986_v13, %v985_v12  ;;  %v987_v19 = vld [vmem:[%s2082_s3 + $0x170] sm:$0xff] }
 0x118   :  { %v268_v32 = vpop.f32.mrb[10].mxu1  ;;  %v422_v33 = vld [vmem:[#allocation2] sm:$0xff]  ;;  %v387_v34 = vpop.f32.mrb[16].mxu0  ;;  %v1542_v22 = vpack.c.bf16 %v988_v20, %v987_v19 }
 0x119   :  { %415 = vst [vmem:[#allocation2 + $0x11] sm:$0xff] %v410_v27  ;;  %v406_v37 = vadd.f32 %v1861_v54, %v394_v28  ;;  %v269_v38 = vadd.f32 %v268_v32, %v1856_v39  ;;  %1304 = vmatmul.mubr.f32.vlgmr.msra.gmra.mrb[18].mxu0 %v422_v33  ;;  %v1192_v40 = vpop.f32.mrb[11].mxu1  ;;  %v1223_v41 = vpop.f32.mrb[17].mxu0  ;;  %v977_v39 = vld [vmem:[%s2082_s3 + $0x120] sm:$0xff] }
 0x11a   :  { %419 = vst [vmem:[#allocation2 + $0x11] sm:$0x1] %v1586_v1  ;;  %420 = vst [vmem:[#allocation2 + $0x12] sm:$0x1] %v1586_v1  ;;  %1522 = vmatpush3.bf16.msra.mxu0 %v1521_v26  ;;  %1306 = vmatprep.mubr.msk.f32.mxu0 %vm1587_vm0, %v1586_v1  ;;  %v1527_v49 = vpack.c.bf16 %v978_v45, %v977_v39 }
 0x11b   :  { %v1922_v43 = vmax.f32 %v406_v37, 0.0  ;;  %v395_v44 = vadd.f32 %v387_v34, %v269_v38  ;;  %1523 = vmatprep.subr.bf16.mxu0 %v1585_v0  ;;  %1504 = vmatpush3.bf16.msra.mxu1 %v1503_v31  ;;  %v2039_v31 = vld [vmem:[%s2083_s4] ss:$0 sm:$0xff] }
 0x11c   :  { %v423_v47 = vld [vmem:[#allocation2 + $0x8] sm:$0xff]  ;;  %1505 = vmatprep.subr.bf16.mxu1 %v1585_v0 }
 0x11d   :  { %416 = vst [vmem:[#allocation2 + $0x19] sm:$0xff] %v1922_v43  ;;  %v407_v48 = vadd.f32 %v1861_v54, %v395_v44  ;;  %1307 = vmatmul.mubr.f32.gmra.mrb[20].mxu0 %v423_v47  ;;  %v980_v54 = vld [vmem:[%s2082_s3 + $0x138] sm:$0xff]  ;;  %v700_v23 = vld [vmem:[#allocation2 + $0x2] sm:$0xff] }
 0x11e   :  { %1525 = vmatpush3.bf16.msra.mxu0 %v1524_v42  ;;  %1309 = vmatprep.mubr.msk.f32.mxu0 %vm1587_vm0, %v1586_v1  ;;  %v1530_v58 = vpack.c.bf16 %v980_v54, %v979_v53 }
 0x11f   :  { %v412_v52 = vmax.f32 %v407_v48, 0.0  ;;  %1526 = vmatprep.subr.bf16.mxu0 %v1585_v0  ;;  %1507 = vmatpush3.bf16.msra.mxu1 %v1506_v46 }
 0x120   :  { %1508 = vmatprep.subr.bf16.mxu1 %v1585_v0 }
 0x121   :  { %417 = vst [vmem:[#allocation2 + $0x21] sm:$0x3] %v412_v52  ;;  %v1950_v55 = vld [vmem:[#allocation2 + $0x11] sm:$0xff] }
 0x122   :  { %v424_v56 = vld [vmem:[#allocation2 + $0x10] sm:$0xff]  ;;  %1528 = vmatpush3.bf16.msra.mxu0 %v1527_v49  ;;  %1263 = vmatmul.mubr.f32.gmra.mrb[16].mxu1 %v1950_v55 }
 0x123   :  { %1310 = vmatmul.mubr.f32.gmra.mrb[22].mxu0 %v424_v56  ;;  %1529 = vmatprep.subr.bf16.mxu0 %v1585_v0  ;;  %v701_v24 = vld [vmem:[#allocation2 + $0xa] sm:$0xff] }
 0x124   :  { %1265 = vmatprep.mubr.msk.f32.mxu1 %vm1587_vm0, %v1586_v1  ;;  %1312 = vmatprep.mubr.msk.f32.mxu0 %vm1587_vm0, %v1586_v1  ;;  %v425_v61 = vld [vmem:[#allocation2 + $0x18] sm:$0xff] }
 0x125   :  { %1510 = vmatpush3.bf16.msra.mxu1 %v1509_v57 }
 0x126   :  { %1531 = vmatpush3.bf16.msra.mxu0 %v1530_v58  ;;  %1266 = vmatmul.mubr.f32.gmra.mrb[18].mxu1 %v1922_v43 }
 0x127   :  { %1313 = vmatmul.mubr.f32.gmra.mrb[24].mxu0 %v425_v61  ;;  %1532 = vmatprep.subr.bf16.mxu0 %v1585_v0 }
 0x128   :  { %1268 = vmatprep.mubr.msk.f32.mxu1 %vm1587_vm0, %v1586_v1  ;;  %1315 = vmatprep.mubr.msk.f32.mxu0 %vm1587_vm0, %v1586_v1  ;;  %v447_v6 = vld [vmem:[#allocation2 + $0x21] sm:$0x3] }
 0x129   :  { %v426_v7 = vld [vmem:[#allocation2 + $0x20] sm:$0x3]  ;;  %1511 = vmatprep.subr.bf16.mxu1 %v1585_v0 }
 0x12a   :  { %1534 = vmatpush3.bf16.msra.mxu0 %v1533_v2  ;;  %1269 = vmatmul.mubr.f32.gmra.mrb[20].mxu1 %v447_v6  ;;  %v682_v25 = vld [vmem:[#allocation2 + $0x21] sm:$0x3] }
 0x12b   :  { %1316 = vmatmul.mubr.f32.gmra.mrb[26].mxu0 %v426_v7  ;;  %1535 = vmatprep.subr.bf16.mxu0 %v1585_v0 }
 0x12c   :  { %1513 = vmatpush3.bf16.msra.mxu1 %v1512_v8  ;;  %1350 = vmatprep.mubr.msk.f32.mxu1 %vm1587_vm0, %v1586_v1 }
 0x12d   :  { %1514 = vmatprep.subr.bf16.mxu1 %v1585_v0  ;;  %1397 = vmatprep.mubr.msk.f32.mxu0 %vm1587_vm0, %v1586_v1 }
 0x12e   :  { %1537 = vmatpush3.bf16.msra.mxu0 %v1536_v11 }
 0x12f   :  { %1538 = vmatprep.subr.bf16.mxu0 %v1585_v0 }
 0x130   :  { %1516 = vmatpush3.bf16.msra.mxu1 %v1515_v15 }
 0x131   :  { %1517 = vmatprep.subr.bf16.mxu1 %v1585_v0 }
 0x132   :  { %1540 = vmatpush3.bf16.msra.mxu0 %v1539_v18 }
 0x133   :  { %1541 = vmatprep.subr.bf16.mxu0 %v1585_v0  ;;  %v702_v0 = vld [vmem:[#allocation2 + $0x12] sm:$0xff] }
 0x134   :  { %1519 = vmatpush3.bf16.msra.mxu1 %v1518_v21 }
 0x136   :  { %1543 = vmatpush3.bf16.msra.mxu0 %v1542_v22 }
 0x137   :  { %1351 = vmatmul.mubr.f32.vlgmr.msra.gmra.mrb[22].mxu1 %v700_v23 }
 0x138   :  { %1353 = vmatprep.mubr.msk.f32.mxu1 %vm1587_vm0, %v1586_v1 }
 0x139   :  { %1398 = vmatmul.mubr.f32.vlgmr.msra.gmra.mrb[28].mxu0 %v1870_v3  ;;  %v703_v3 = vld [vmem:[#allocation2 + $0x1a] sm:$0xff] }
 0x13a   :  { %1400 = vmatprep.mubr.msk.f32.mxu0 %vm1587_vm0, %v1586_v1 }
 0x13b   :  { %1354 = vmatmul.mubr.f32.gmra.mrb[24].mxu1 %v701_v24 }
 0x13c   :  { %1356 = vmatprep.mubr.msk.f32.mxu1 %vm1587_vm0, %v1586_v1 }
 0x13d   :  { %1401 = vmatmul.mubr.f32.gmra.mrb[30].mxu0 %v1883_v14  ;;  %v704_v14 = vld [vmem:[#allocation2 + $0x22] sm:$0x3] }
 0x13e   :  { %1403 = vmatprep.mubr.msk.f32.mxu0 %vm1587_vm0, %v1586_v1 }
 0x13f   :  { %1357 = vmatmul.mubr.f32.gmra.mrb[26].mxu1 %v702_v0 }
 0x140   :  { %1359 = vmatprep.mubr.msk.f32.mxu1 %vm1587_vm0, %v1586_v1 }
 0x141   :  { %1404 = vmatmul.mubr.f32.gmra.mrb[32].mxu0 %v1950_v55 }
 0x142   :  { %1406 = vmatprep.mubr.msk.f32.mxu0 %vm1587_vm0, %v1586_v1 }
 0x143   :  { %1360 = vmatmul.mubr.f32.gmra.mrb[28].mxu1 %v703_v3 }
 0x144   :  { %1362 = vmatprep.mubr.msk.f32.mxu1 %vm1587_vm0, %v1586_v1 }
 0x145   :  { %1407 = vmatmul.mubr.f32.gmra.mrb[34].mxu0 %v1922_v43 }
 0x146   :  { %1409 = vmatprep.mubr.msk.f32.mxu0 %vm1587_vm0, %v1586_v1 }
 0x147   :  { %1363 = vmatmul.mubr.f32.gmra.mrb[30].mxu1 %v704_v14 }
 0x149   :  { %1410 = vmatmul.mubr.f32.gmra.mrb[36].mxu0 %v682_v25 }
 0x1e4   :  { %v531_v26 = vpop.f32.mrb[12].mxu1 }
 0x1e5   :  { %v1258_v27 = vpop.f32.mrb[13].mxu1 }
 0x1e8   :  { %v536_v28 = vpop.f32.mrb[14].mxu1 }
 0x1e9   :  { %v1261_v29 = vpop.f32.mrb[15].mxu1 }
 0x1ec   :  { %v621_v30 = vpop.f32.mrb[18].mxu0 }
 0x1ed   :  { %v622_v32 = vadd.f32 %v621_v30, %v531_v26  ;;  %v1305_v33 = vpop.f32.mrb[19].mxu0 }
 0x1ef   :  { %v652_v34 = vadd.f32 %v2039_v31, %v622_v32 }
 0x1f0   :  { %v626_v35 = vpop.f32.mrb[20].mxu0 }
 0x1f1   :  { %v657_v1 = vmax.f32 %v652_v34, 0.0  ;;  %v627_v36 = vadd.f32 %v626_v35, %v536_v28  ;;  %v1308_v37 = vpop.f32.mrb[21].mxu0 }
 0x1f3   :  { %662 = vst [vmem:[%s2084_s5] sm:$0xff] %v657_v1  ;;  %v653_v38 = vadd.f32 %v2039_v31, %v627_v36 }
 0x1f5   :  { %v658_v40 = vmax.f32 %v653_v38, 0.0  ;;  %v541_v41 = vpop.f32.mrb[16].mxu1 }
 0x1f6   :  { %v631_v42 = vpop.f32.mrb[22].mxu0  ;;  %v1264_v43 = vpop.f32.mrb[17].mxu1 }
 0x1f7   :  { %663 = vst [vmem:[%s2084_s5 + $0x10] sm:$0xff] %v658_v40  ;;  %v632_v44 = vadd.f32 %v631_v42, %v541_v41  ;;  %v1311_v39 = vpop.f32.mrb[23].mxu0 }
 0x1f9   :  { %v654_v45 = vadd.f32 %v2039_v31, %v632_v44  ;;  %v546_v46 = vpop.f32.mrb[18].mxu1 }
 0x1fa   :  { %v636_v47 = vpop.f32.mrb[24].mxu0  ;;  %v1267_v48 = vpop.f32.mrb[19].mxu1 }
 0x1fb   :  { %v637_v49 = vadd.f32 %v636_v47, %v546_v46  ;;  %v1314_v50 = vpop.f32.mrb[25].mxu0  ;;  %v659_v51 = vmax.f32 %v654_v45, 0.0 }
 0x1fd   :  { %v655_v52 = vadd.f32 %v2039_v31, %v637_v49  ;;  %v551_v53 = vpop.f32.mrb[20].mxu1  ;;  %v668_v59 = vrot.slane %v659_v51, 2 }
 0x1fe   :  { %v641_v54 = vpop.f32.mrb[26].mxu0  ;;  %v1270_v55 = vpop.f32.mrb[21].mxu1 }
 0x1ff   :  { %v660_v56 = vmax.f32 %v655_v52, 0.0  ;;  %v642_v57 = vadd.f32 %v641_v54, %v551_v53  ;;  %v1317_v58 = vpop.f32.mrb[27].mxu0 }
 0x201   :  { %v669_v60 = vrot.slane %v660_v56, 2  ;;  %v656_v61 = vadd.f32 %v2039_v31, %v642_v57 }
 0x203   :  { %v670_v62 = vsel %vm667_vm2, %v668_v59, %v669_v60  ;;  %v661_v63 = vmax.f32 %v656_v61, 0.0 }
 0x204   :  { %971 = vst [vmem:[%s2084_s5 + $0x20] sm:$0xff] %v670_v62 }
 0x205   :  { %v671_v2 = vrot.slane %v661_v63, 2 }
 0x207   :  { %v672_v4 = vsel %vm667_vm2, %v669_v60, %v671_v2 }
 0x208   :  { %972 = vst [vmem:[%s2084_s5 + $0x30] sm:$0xff] %v672_v4 }
 0x20a   :  { %v788_v5 = vpop.f32.mrb[22].mxu1 }
 0x20b   :  { %v1352_v6 = vpop.f32.mrb[23].mxu1 }
 0x20c   :  { %v878_v7 = vpop.f32.mrb[28].mxu0 }
 0x20d   :  { %v879_v8 = vadd.f32 %v878_v7, %v788_v5  ;;  %v1399_v9 = vpop.f32.mrb[29].mxu0 }
 0x20e   :  { %v793_v10 = vpop.f32.mrb[24].mxu1 }
 0x20f   :  { %v909_v11 = vadd.f32 %v2039_v31, %v879_v8  ;;  %v1355_v12 = vpop.f32.mrb[25].mxu1 }
 0x210   :  { %v883_v13 = vpop.f32.mrb[30].mxu0 }
 0x211   :  { %v914_v15 = vmax.f32 %v909_v11, 0.0  ;;  %v884_v16 = vadd.f32 %v883_v13, %v793_v10  ;;  %v1402_v17 = vpop.f32.mrb[31].mxu0 }
 0x212   :  { %v798_v18 = vpop.f32.mrb[26].mxu1 }
 0x213   :  { %919 = vst [vmem:[%s2084_s5 + $0x8] sm:$0xff] %v914_v15  ;;  %v910_v19 = vadd.f32 %v2039_v31, %v884_v16  ;;  %v1358_v20 = vpop.f32.mrb[27].mxu1 }
 0x214   :  { %v888_v21 = vpop.f32.mrb[32].mxu0 }
 0x215   :  { %v915_v22 = vmax.f32 %v910_v19, 0.0  ;;  %v889_v23 = vadd.f32 %v888_v21, %v798_v18  ;;  %v1405_v24 = vpop.f32.mrb[33].mxu0 }
 0x216   :  { %v803_v0 = vpop.f32.mrb[28].mxu1 }
 0x217   :  { %920 = vst [vmem:[%s2084_s5 + $0x18] sm:$0xff] %v915_v22  ;;  %v911_v3 = vadd.f32 %v2039_v31, %v889_v23  ;;  %v1361_v14 = vpop.f32.mrb[29].mxu1 }
 0x218   :  { %v893_v25 = vpop.f32.mrb[34].mxu0 }
 0x219   :  { %v894_v26 = vadd.f32 %v893_v25, %v803_v0  ;;  %v1408_v27 = vpop.f32.mrb[35].mxu0  ;;  %v916_v29 = vmax.f32 %v911_v3, 0.0 }
 0x21a   :  { %v808_v28 = vpop.f32.mrb[30].mxu1 }
 0x21b   :  { %v912_v30 = vadd.f32 %v2039_v31, %v894_v26  ;;  %v1364_v32 = vpop.f32.mrb[31].mxu1  ;;  %v924_v36 = vrot.slane %v916_v29, 2 }
 0x21c   :  { %v898_v33 = vpop.f32.mrb[36].mxu0 }
 0x21d   :  { %v917_v34 = vmax.f32 %v912_v30, 0.0  ;;  %v899_v35 = vadd.f32 %v898_v33, %v808_v28  ;;  %v1411_v1 = vpop.f32.mrb[37].mxu0 }
 0x21f   :  { %v925_v37 = vrot.slane %v917_v34, 2  ;;  %v913_v38 = vadd.f32 %v2039_v31, %v899_v35 }
 0x221   :  { %v926_v40 = vsel %vm667_vm2, %v924_v36, %v925_v37  ;;  %v918_v41 = vmax.f32 %v913_v38, 0.0 }
 0x222   :  { %1006 = vst [vmem:[%s2084_s5 + $0x28] sm:$0xff] %v926_v40 }
 0x223   :  { %v927_v42 = vrot.slane %v918_v41, 2 }
 0x225   :  { %v928_v43 = vsel %vm667_vm2, %v925_v37, %v927_v42 }
 0x226   :  { %1007 = vst [vmem:[%s2084_s5 + $0x38] sm:$0xff] %v928_v43 }
 0x227   :  { %937 = vsyncpa [#allocation4], 1 }

</bundles_post_ra>
